<compile_context>
chip_gen: v7x
topology: tpu7x:2x2x1
jax: 0.10.0
libtpu: 0.0.40
codegen_flags: <defaults>
</compile_context>

<pallas_src>
import functools

import jax
import jax.numpy as jnp
from jax.experimental import pallas as pl
from jax.experimental.pallas import tpu as pltpu


# ----------------------------- kernels -----------------------------------------------


def _conv_in_lrelu_kernel(patches_ref, w_ref, out_ref, sum_ref, ssq_ref, *,
                          eps: float, neg_slope: float, p_valid: int, tp: int):
    """Conv (as matmul) + InstanceNorm + LeakyReLU with a P-resident output block.

    patches_ref: [Kd, tp]    bf16   (Kd = Cin*K*K, tp = spatial tile on the lane axis)
    w_ref:       [tc, Kd]    bf16   (resident; block index never changes)
    out_ref:     [tc, P_pad] f32    (resident in VMEM across the P grid axis)
    sum_ref/ssq_ref: [tc, 1] f32    running per-channel sum / sum of squares
    """
    p = pl.program_id(2)

    @pl.when(p == 0)
    def _init():
        sum_ref[...] = jnp.zeros_like(sum_ref)
        ssq_ref[...] = jnp.zeros_like(ssq_ref)

    # Conv tile on the MXU: [tc, Kd] @ [Kd, tp] -> f32 [tc, tp].
    # The conv bias is intentionally NOT added here: a per-channel constant is exactly
    # cancelled by InstanceNorm, and dropping it improves the variance conditioning.
    x = jnp.dot(w_ref[...], patches_ref[...], preferred_element_type=jnp.float32)

    # Padded spatial lanes hold exact zeros (zero-padded patches, no bias), so they
    # contribute nothing to the statistics -> no masking needed on any tile.
    sum_ref[...] += jnp.sum(x, axis=1, keepdims=True)
    ssq_ref[...] += jnp.sum(x * x, axis=1, keepdims=True)

    off = pl.multiple_of(p * tp, 128)
    out_ref[:, pl.ds(off, tp)] = x                       # stash raw conv result

    @pl.when(p == pl.num_programs(2) - 1)
    def _finalize():
        # InstanceNorm2d defaults: biased variance over H*W, eps inside rsqrt, no affine.
        inv_n = 1.0 / float(p_valid)
        mean = sum_ref[...] * inv_n                      # [tc, 1]
        var = jnp.maximum(ssq_ref[...] * inv_n - mean * mean, 0.0)
        inv_std = jax.lax.rsqrt(var + eps)
        y = (out_ref[...] - mean) * inv_std              # broadcasts over [tc, P_pad]
        out_ref[...] = jnp.maximum(y, neg_slope * y)     # LeakyReLU (slope in (0,1))


def _conv_lrelu_kernel(patches_ref, w_ref, b_ref, out_ref, *, neg_slope: float):
    """Conv (as matmul) + bias + LeakyReLU, per-p output block (no residency)."""
    x = jnp.dot(w_ref[...], patches_ref[...], preferred_element_type=jnp.float32)
    x = x + b_ref[...]                                   # conv bias (broadcast over lanes)
    out_ref[...] = jnp.maximum(x, neg_slope * x)


# ----------------------------- wrapper ------------------------------------------------


def _round_up(v, m):
    return ((v + m - 1) // m) * m


def _vmem_capacity_bytes():
    try:
        cap = getattr(pltpu.get_tpu_info(), "vmem_capacity_bytes", None)
        if cap:
            return int(cap)
    except Exception:
        pass
    return 64 * 2**20   # conservative default (v7x-sized); safe on all generations


def downsample(x, weight, bias, *, stride=2, padding=1,
               apply_norm=True, eps=1e-5, neg_slope=0.2):
    """x: [N, Cin, H, W] (NCHW), weight: [Cout, Cin, K, K] (OIHW), bias: [Cout]."""
    N, Cin, H, W = x.shape
    Cout, _, K, _ = weight.shape
    Ho = (H + 2 * padding - K) // stride + 1
    Wo = (W + 2 * padding - K) // stride + 1
    P = Ho * Wo
    Kd = Cin * K * K

    # ---- im2col in [N, Kd, P] layout (spatial on the lane axis), bf16 ----
    # TODO(synk): this buffer (~4x the input elements) is still materialized by XLA;
    # eliminating it needs in-kernel overlapping-window DMA from the raw padded input.
    xp = jnp.pad(x, ((0, 0), (0, 0), (padding, padding), (padding, padding)))
    cols = []
    for i in range(K):          # kh (outer) -> matches OIHW flatten order
        for j in range(K):      # kw (inner)
            cols.append(xp[:, :, i:i + stride * Ho:stride, j:j + stride * Wo:stride])
    patches = jnp.stack(cols, axis=2).reshape(N, Kd, P)   # [N, Kd, P]

    # Spatial tile: large lane tiles amortize per-grid-step overhead.
    tp = min(512, _round_up(P, 128))
    n_p = pl.cdiv(P, tp)
    P_pad = n_p * tp
    if P_pad != P:
        patches = jnp.pad(patches, ((0, 0), (0, 0), (0, P_pad - P)))   # exact zeros
    patches = patches.astype(jnp.bfloat16)                 # bf16 MXU operand

    w_mat = weight.reshape(Cout, Kd).astype(jnp.bfloat16)  # [Cout, Kd]
    b_col = bias.astype(jnp.float32).reshape(Cout, 1)      # [Cout, 1]

    # ---- channel tile from the per-generation VMEM budget ----
    vmem_cap = _vmem_capacity_bytes()
    budget = int(0.70 * min(vmem_cap, 128 * 2**20))

    def _vmem_est(tc_, single_buffer):
        res = 1 if single_buffer else 2
        out_b = (res * tc_ * P_pad * 4) if apply_norm else (2 * tc_ * tp * 4)
        return (2 * Kd * tp * 2                    # patch tile, double-buffered, bf16
                + res * tc_ * max(Kd, 128) * 2     # weights (lane-padded)
                + res * max(tc_, 8) * 128 * 4      # bias (lane-padded)
                + out_b                            # output block(s)
                + 2 * max(tc_, 8) * 128 * 4)       # stats scratch

    # Megacore (v7x): when there is only one image, split channels into two parallel
    # tiles so the second TensorCore has work (costs one extra patch stream elsewhere).
    prefer_split = (N == 1 and Cout >= 16 and Cout % 16 == 0)
    cands = [Cout // 2] if prefer_split else [Cout]
    cands += [d for d in (256, 128, 64, 32, 16, 8) if d < cands[0] and Cout % d == 0]
    tc = None
    for c in cands:
        if _vmem_est(c, False) <= budget:          # conservative: assume double-buffered
            tc = c
            break
    if tc is None:
        # TODO(synk): two-pass fallback (conv+stats pass, then normalize pass) for shapes
        # where even the smallest channel tile's resident output exceeds VMEM.
        tc = cands[-1]
    n_c = Cout // tc

    def _run(single_buffer):
        pm = {"pipeline_mode": pl.Buffered(1)} if single_buffer else {}
        est = _vmem_est(tc, single_buffer)
        vmem_limit = int(min(vmem_cap - 4 * 2**20, max(1.5 * est, 32 * 2**20)))

        if apply_norm:
            kern = functools.partial(_conv_in_lrelu_kernel, eps=eps,
                                     neg_slope=neg_slope, p_valid=P, tp=tp)
            in_specs = [
                pl.BlockSpec((None, Kd, tp), lambda n, c, p: (n, 0, p)),       # patches
                pl.BlockSpec((tc, Kd), lambda n, c, p: (c, 0), **pm),          # weights
            ]
            out_specs = pl.BlockSpec((None, tc, P_pad), lambda n, c, p: (n, c, 0), **pm)
            scratch = [pltpu.VMEM((tc, 1), jnp.float32),
                       pltpu.VMEM((tc, 1), jnp.float32)]
            dims = ("parallel", "parallel", "arbitrary")
            args = (patches, w_mat)
        else:
            kern = functools.partial(_conv_lrelu_kernel, neg_slope=neg_slope)
            in_specs = [
                pl.BlockSpec((None, Kd, tp), lambda n, c, p: (n, 0, p)),       # patches
                pl.BlockSpec((tc, Kd), lambda n, c, p: (c, 0), **pm),          # weights
                pl.BlockSpec((tc, 1), lambda n, c, p: (c, 0), **pm),           # bias
            ]
            out_specs = pl.BlockSpec((None, tc, tp), lambda n, c, p: (n, c, p))
            scratch = []
            dims = ("parallel", "parallel", "parallel")
            args = (patches, w_mat, b_col)

        out_ = pl.pallas_call(
            kern,
            out_shape=jax.ShapeDtypeStruct((N, Cout, P_pad), jnp.float32),
            grid_spec=pltpu.PrefetchScalarGridSpec(
                num_scalar_prefetch=0,
                grid=(N, n_c, n_p),
                in_specs=in_specs,
                out_specs=out_specs,
                scratch_shapes=scratch),
            compiler_params=pltpu.CompilerParams(
                dimension_semantics=dims, vmem_limit_bytes=vmem_limit),
        )(*args)
        return jax.block_until_ready(out_)

    try:
        out = _run(True)            # single-buffer resident / never-changing blocks
    except Exception:
        out = _run(False)           # fall back to default double-buffering

    # [N, Cout, P_pad] -> drop lane padding -> NCHW (no transpose needed)
    return out[:, :, :P].reshape(N, Cout, Ho, Wo)


# ----------------------------- reference & test ----------------------------------------


def reference(x, weight, bias, *, apply_norm=True, eps=1e-5, neg_slope=0.2):
    """Pure-JAX reference matching PyTorch semantics (f32 conv)."""
    y = jax.lax.conv_general_dilated(
        x, weight, window_strides=(2, 2), padding=((1, 1), (1, 1)),
        dimension_numbers=("NCHW", "OIHW", "NCHW"),
        precision=jax.lax.Precision.HIGHEST)
    y = y + bias.reshape(1, -1, 1, 1)
    if apply_norm:
        mean = y.mean(axis=(2, 3), keepdims=True)
        var = ((y - mean) ** 2).mean(axis=(2, 3), keepdims=True)
        y = (y - mean) / jnp.sqrt(var + eps)
    return jnp.where(y >= 0, y, neg_slope * y)


if __name__ == "__main__":
    key = jax.random.PRNGKey(0)
    kx, kw, kb = jax.random.split(key, 3)

    N, Cin, H, W = 2, 4, 16, 16
    Cout, K = 8, 4

    x = jax.random.normal(kx, (N, Cin, H, W), dtype=jnp.float32)
    # deterministic synthetic params (shapes per nn.Conv2d(Cin, Cout, 4, 2, 1, bias=True))
    fan_in = Cin * K * K
    bound = 1.0 / (fan_in ** 0.5)
    weight = jax.random.uniform(kw, (Cout, Cin, K, K), jnp.float32, -bound, bound)
    bias = jax.random.uniform(kb, (Cout,), jnp.float32, -bound, bound)

    for apply_norm in (True, False):
        out = jax.block_until_ready(downsample(x, weight, bias, apply_norm=apply_norm))
        assert out.shape == (N, Cout, H // 2, W // 2), out.shape

        # semantic check vs. the full-f32 reference (loose: kernel uses bf16 MXU operands)
        ref = reference(x, weight, bias, apply_norm=apply_norm)
        assert jnp.allclose(out, ref, atol=5e-2, rtol=5e-2), \
            (apply_norm, float(jnp.max(jnp.abs(out - ref))))

        # apples-to-apples check vs. a reference fed the same bf16-rounded operands
        xr = x.astype(jnp.bfloat16).astype(jnp.float32)
        wr = weight.astype(jnp.bfloat16).astype(jnp.float32)
        ref_bf = reference(xr, wr, bias, apply_norm=apply_norm)
        assert jnp.allclose(out, ref_bf, atol=5e-3, rtol=5e-3), \
            (apply_norm, float(jnp.max(jnp.abs(out - ref_bf))))

    print("KERNEL_OK")
</pallas_src>

<mosaic_0001>
module attributes {stable_mosaic.version = 11 : i64} {
  func.func @_conv_in_lrelu_kernel(%arg0: i32, %arg1: i32, %arg2: i32, %arg3: memref<1x64x128xbf16, #tpu.memory_space<vmem>>, %arg4: memref<8x64xbf16, #tpu.memory_space<vmem>>, %arg5: memref<1x8x128xf32, #tpu.memory_space<vmem>>, %arg6: memref<8x1xf32, #tpu.memory_space<vmem>>, %arg7: memref<8x1xf32, #tpu.memory_space<vmem>>) attributes {dimension_semantics = [#tpu.dimension_semantics<parallel>, #tpu.dimension_semantics<parallel>, #tpu.dimension_semantics<arbitrary>], iteration_bounds = array<i64: 2, 1, 1>, scalar_prefetch = 0 : i64, scratch_operands = 2 : i64, tpu.core_type = #tpu.core_type<tc>, window_params = [{transform_indices = @transform_0, window_bounds = array<i64: 1, 64, 128>}, {pipeline_mode = #tpu.pipeline_mode<synchronous>, transform_indices = @transform_1, window_bounds = array<i64: 8, 64>}, {pipeline_mode = #tpu.pipeline_mode<synchronous>, transform_indices = @transform_2, window_bounds = array<i64: 1, 8, 128>}]} {
    %c0_i32 = arith.constant 0 : i32
    %0 = arith.cmpi eq, %arg2, %c0_i32 : i32
    %1 = arith.extui %0 : i1 to i32
    %c0_i32_0 = arith.constant 0 : i32
    %2 = arith.cmpi ne, %1, %c0_i32_0 : i32
    scf.if %2 {
      %cst_19 = arith.constant 0.000000e+00 : f32
      %27 = vector.broadcast %cst_19 : f32 to vector<8x1xf32>
      %c0_20 = arith.constant 0 : index
      %c0_21 = arith.constant 0 : index
      %28 = vector.load %arg6[%c0_20, %c0_21] : memref<8x1xf32, #tpu.memory_space<vmem>>, vector<8x1xf32>
      tpu.vector_store %arg6[%c0_20, %c0_21], %27 {strides = array<i32>} : memref<8x1xf32, #tpu.memory_space<vmem>>, vector<8x1xf32>,
      %cst_22 = arith.constant 0.000000e+00 : f32
      %29 = vector.broadcast %cst_22 : f32 to vector<8x1xf32>
      %c0_23 = arith.constant 0 : index
      %c0_24 = arith.constant 0 : index
      %30 = vector.load %arg7[%c0_23, %c0_24] : memref<8x1xf32, #tpu.memory_space<vmem>>, vector<8x1xf32>
      tpu.vector_store %arg7[%c0_23, %c0_24], %29 {strides = array<i32>} : memref<8x1xf32, #tpu.memory_space<vmem>>, vector<8x1xf32>,
    } else {
    }
    %c0 = arith.constant 0 : index
    %c0_1 = arith.constant 0 : index
    %3 = vector.load %arg4[%c0, %c0_1] : memref<8x64xbf16, #tpu.memory_space<vmem>>, vector<8x64xbf16>
    %c0_2 = arith.constant 0 : index
    %c0_3 = arith.constant 0 : index
    %c0_4 = arith.constant 0 : index
    %4 = vector.load %arg3[%c0_2, %c0_3, %c0_4] : memref<1x64x128xbf16, #tpu.memory_space<vmem>>, vector<1x64x128xbf16>
    %5 = vector.shape_cast %4 : vector<1x64x128xbf16> to vector<64x128xbf16>
    %cst = arith.constant dense<0.000000e+00> : vector<8x128xf32>
    %6 = tpu.matmul %3, %5, %cst {dimension_numbers = #tpu.dot_dimension_numbers<[1], [0], [0], [1], [0, 0, 1, 1], [], []>} : vector<8x64xbf16>, vector<64x128xbf16>, vector<8x128xf32> -> vector<8x128xf32>
    %c0_5 = arith.constant 0 : index
    %c0_6 = arith.constant 0 : index
    %7 = vector.load %arg6[%c0_5, %c0_6] : memref<8x1xf32, #tpu.memory_space<vmem>>, vector<8x1xf32>
    %cst_7 = arith.constant dense<0.000000e+00> : vector<8xf32>
    %8 = vector.multi_reduction <add>, %6, %cst_7 [1] : vector<8x128xf32> to vector<8xf32>
    %9 = vector.shape_cast %8 : vector<8xf32> to vector<8x1xf32>
    %10 = arith.addf %7, %9 : vector<8x1xf32>
    %c0_8 = arith.constant 0 : index
    %c0_9 = arith.constant 0 : index
    %11 = vector.load %arg6[%c0_8, %c0_9] : memref<8x1xf32, #tpu.memory_space<vmem>>, vector<8x1xf32>
    tpu.vector_store %arg6[%c0_8, %c0_9], %10 {strides = array<i32>} : memref<8x1xf32, #tpu.memory_space<vmem>>, vector<8x1xf32>,
    %c0_10 = arith.constant 0 : index
    %c0_11 = arith.constant 0 : index
    %12 = vector.load %arg7[%c0_10, %c0_11] : memref<8x1xf32, #tpu.memory_space<vmem>>, vector<8x1xf32>
    %13 = arith.mulf %6, %6 : vector<8x128xf32>
    %cst_12 = arith.constant dense<0.000000e+00> : vector<8xf32>
    %14 = vector.multi_reduction <add>, %13, %cst_12 [1] : vector<8x128xf32> to vector<8xf32>
    %15 = vector.shape_cast %14 : vector<8xf32> to vector<8x1xf32>
    %16 = arith.addf %12, %15 : vector<8x1xf32>
    %c0_13 = arith.constant 0 : index
    %c0_14 = arith.constant 0 : index
    %17 = vector.load %arg7[%c0_13, %c0_14] : memref<8x1xf32, #tpu.memory_space<vmem>>, vector<8x1xf32>
    tpu.vector_store %arg7[%c0_13, %c0_14], %16 {strides = array<i32>} : memref<8x1xf32, #tpu.memory_space<vmem>>, vector<8x1xf32>,
    %c128_i32 = arith.constant 128 : i32
    %18 = arith.muli %arg2, %c128_i32 : i32
    %19 = tpu.assume_multiple %18, 128 : i32
    %c0_15 = arith.constant 0 : index
    %c0_16 = arith.constant 0 : index
    %20 = arith.index_cast %19 : i32 to index
    %21 = vector.load %arg5[%c0_15, %c0_16, %20] : memref<1x8x128xf32, #tpu.memory_space<vmem>>, vector<1x8x128xf32>
    %22 = vector.shape_cast %21 : vector<1x8x128xf32> to vector<8x128xf32>
    %23 = vector.shape_cast %6 : vector<8x128xf32> to vector<1x8x128xf32>
    tpu.vector_store %arg5[%c0_15, %c0_16, %20], %23 {strides = array<i32>} : memref<1x8x128xf32, #tpu.memory_space<vmem>>, vector<1x8x128xf32>,
    %c0_i32_17 = arith.constant 0 : i32
    %24 = arith.cmpi eq, %arg2, %c0_i32_17 : i32
    %25 = arith.extui %24 : i1 to i32
    %c0_i32_18 = arith.constant 0 : i32
    %26 = arith.cmpi ne, %25, %c0_i32_18 : i32
    scf.if %26 {
      %c0_19 = arith.constant 0 : index
      %c0_20 = arith.constant 0 : index
      %27 = vector.load %arg6[%c0_19, %c0_20] : memref<8x1xf32, #tpu.memory_space<vmem>>, vector<8x1xf32>
      %cst_21 = arith.constant 1.562500e-02 : f32
      %28 = vector.broadcast %cst_21 : f32 to vector<8x1xf32>
      %29 = arith.mulf %27, %28 : vector<8x1xf32>
      %c0_22 = arith.constant 0 : index
      %c0_23 = arith.constant 0 : index
      %30 = vector.load %arg7[%c0_22, %c0_23] : memref<8x1xf32, #tpu.memory_space<vmem>>, vector<8x1xf32>
      %cst_24 = arith.constant 1.562500e-02 : f32
      %31 = vector.broadcast %cst_24 : f32 to vector<8x1xf32>
      %32 = arith.mulf %30, %31 : vector<8x1xf32>
      %33 = arith.mulf %29, %29 : vector<8x1xf32>
      %34 = arith.subf %32, %33 : vector<8x1xf32>
      %cst_25 = arith.constant 0.000000e+00 : f32
      %35 = vector.broadcast %cst_25 : f32 to vector<8x1xf32>
      %36 = arith.maximumf %34, %35 : vector<8x1xf32>
      %cst_26 = arith.constant 9.99999974E-6 : f32
      %37 = vector.broadcast %cst_26 : f32 to vector<8x1xf32>
      %38 = arith.addf %36, %37 : vector<8x1xf32>
      %39 = math.rsqrt %38 : vector<8x1xf32>
      %c0_27 = arith.constant 0 : index
      %c0_28 = arith.constant 0 : index
      %c0_29 = arith.constant 0 : index
      %40 = vector.load %arg5[%c0_27, %c0_28, %c0_29] : memref<1x8x128xf32, #tpu.memory_space<vmem>>, vector<1x8x128xf32>
      %41 = vector.shape_cast %40 : vector<1x8x128xf32> to vector<8x128xf32>
      %42 = vector.broadcast %29 : vector<8x1xf32> to vector<8x128xf32>
      %43 = arith.subf %41, %42 : vector<8x128xf32>
      %44 = vector.broadcast %39 : vector<8x1xf32> to vector<8x128xf32>
      %45 = arith.mulf %43, %44 : vector<8x128xf32>
      %cst_30 = arith.constant 2.000000e-01 : f32
      %46 = vector.broadcast %cst_30 : f32 to vector<8x128xf32>
      %47 = arith.mulf %46, %45 : vector<8x128xf32>
      %48 = arith.maximumf %45, %47 : vector<8x128xf32>
      %c0_31 = arith.constant 0 : index
      %c0_32 = arith.constant 0 : index
      %c0_33 = arith.constant 0 : index
      %49 = vector.load %arg5[%c0_31, %c0_32, %c0_33] : memref<1x8x128xf32, #tpu.memory_space<vmem>>, vector<1x8x128xf32>
      %50 = vector.shape_cast %49 : vector<1x8x128xf32> to vector<8x128xf32>
      %51 = vector.shape_cast %48 : vector<8x128xf32> to vector<1x8x128xf32>
      tpu.vector_store %arg5[%c0_31, %c0_32, %c0_33], %51 {strides = array<i32>} : memref<1x8x128xf32, #tpu.memory_space<vmem>>, vector<1x8x128xf32>,
    } else {
    }
    return
  }
  func.func @transform_0(%arg0: i32, %arg1: i32, %arg2: i32) -> (i32, i32, i32) {
    %c0_i32 = arith.constant 0 : i32
    %c0_i32_0 = arith.constant 0 : i32
    return %arg0, %c0_i32, %arg2 : i32, i32, i32
  }
  func.func @transform_1(%arg0: i32, %arg1: i32, %arg2: i32) -> (i32, i32) {
    %c0_i32 = arith.constant 0 : i32
    %c0_i32_0 = arith.constant 0 : i32
    return %arg1, %c0_i32 : i32, i32
  }
  func.func @transform_2(%arg0: i32, %arg1: i32, %arg2: i32) -> (i32, i32, i32) {
    %c0_i32 = arith.constant 0 : i32
    %c0_i32_0 = arith.constant 0 : i32
    return %arg0, %arg1, %c0_i32 : i32, i32, i32
  }
}

module attributes {stable_mosaic.version = 11 : i64} {
  func.func @_conv_in_lrelu_kernel(%arg0: i32, %arg1: i32, %arg2: i32, %arg3: memref<1x64x128xbf16, #tpu.memory_space<vmem>>, %arg4: memref<8x64xbf16, #tpu.memory_space<vmem>>, %arg5: memref<1x8x128xf32, #tpu.memory_space<vmem>>, %arg6: memref<8x1xf32, #tpu.memory_space<vmem>>, %arg7: memref<8x1xf32, #tpu.memory_space<vmem>>) attributes {dimension_semantics = [#tpu.dimension_semantics<parallel>, #tpu.dimension_semantics<parallel>, #tpu.dimension_semantics<arbitrary>], iteration_bounds = array<i64: 2, 1, 1>, scalar_prefetch = 0 : i64, scratch_operands = 2 : i64, tpu.core_type = #tpu.core_type<tc>, window_params = [{transform_indices = @transform_0, window_bounds = array<i64: 1, 64, 128>}, {transform_indices = @transform_1, window_bounds = array<i64: 8, 64>}, {transform_indices = @transform_2, window_bounds = array<i64: 1, 8, 128>}]} {
    %c0_i32 = arith.constant 0 : i32
    %0 = arith.cmpi eq, %arg2, %c0_i32 : i32
    %1 = arith.extui %0 : i1 to i32
    %c0_i32_0 = arith.constant 0 : i32
    %2 = arith.cmpi ne, %1, %c0_i32_0 : i32
    scf.if %2 {
      %cst_19 = arith.constant 0.000000e+00 : f32
      %27 = vector.broadcast %cst_19 : f32 to vector<8x1xf32>
      %c0_20 = arith.constant 0 : index
      %c0_21 = arith.constant 0 : index
      %28 = vector.load %arg6[%c0_20, %c0_21] : memref<8x1xf32, #tpu.memory_space<vmem>>, vector<8x1xf32>
      tpu.vector_store %arg6[%c0_20, %c0_21], %27 {strides = array<i32>} : memref<8x1xf32, #tpu.memory_space<vmem>>, vector<8x1xf32>,
      %cst_22 = arith.constant 0.000000e+00 : f32
      %29 = vector.broadcast %cst_22 : f32 to vector<8x1xf32>
      %c0_23 = arith.constant 0 : index
      %c0_24 = arith.constant 0 : index
      %30 = vector.load %arg7[%c0_23, %c0_24] : memref<8x1xf32, #tpu.memory_space<vmem>>, vector<8x1xf32>
      tpu.vector_store %arg7[%c0_23, %c0_24], %29 {strides = array<i32>} : memref<8x1xf32, #tpu.memory_space<vmem>>, vector<8x1xf32>,
    } else {
    }
    %c0 = arith.constant 0 : index
    %c0_1 = arith.constant 0 : index
    %3 = vector.load %arg4[%c0, %c0_1] : memref<8x64xbf16, #tpu.memory_space<vmem>>, vector<8x64xbf16>
    %c0_2 = arith.constant 0 : index
    %c0_3 = arith.constant 0 : index
    %c0_4 = arith.constant 0 : index
    %4 = vector.load %arg3[%c0_2, %c0_3, %c0_4] : memref<1x64x128xbf16, #tpu.memory_space<vmem>>, vector<1x64x128xbf16>
    %5 = vector.shape_cast %4 : vector<1x64x128xbf16> to vector<64x128xbf16>
    %cst = arith.constant dense<0.000000e+00> : vector<8x128xf32>
    %6 = tpu.matmul %3, %5, %cst {dimension_numbers = #tpu.dot_dimension_numbers<[1], [0], [0], [1], [0, 0, 1, 1], [], []>} : vector<8x64xbf16>, vector<64x128xbf16>, vector<8x128xf32> -> vector<8x128xf32>
    %c0_5 = arith.constant 0 : index
    %c0_6 = arith.constant 0 : index
    %7 = vector.load %arg6[%c0_5, %c0_6] : memref<8x1xf32, #tpu.memory_space<vmem>>, vector<8x1xf32>
    %cst_7 = arith.constant dense<0.000000e+00> : vector<8xf32>
    %8 = vector.multi_reduction <add>, %6, %cst_7 [1] : vector<8x128xf32> to vector<8xf32>
    %9 = vector.shape_cast %8 : vector<8xf32> to vector<8x1xf32>
    %10 = arith.addf %7, %9 : vector<8x1xf32>
    %c0_8 = arith.constant 0 : index
    %c0_9 = arith.constant 0 : index
    %11 = vector.load %arg6[%c0_8, %c0_9] : memref<8x1xf32, #tpu.memory_space<vmem>>, vector<8x1xf32>
    tpu.vector_store %arg6[%c0_8, %c0_9], %10 {strides = array<i32>} : memref<8x1xf32, #tpu.memory_space<vmem>>, vector<8x1xf32>,
    %c0_10 = arith.constant 0 : index
    %c0_11 = arith.constant 0 : index
    %12 = vector.load %arg7[%c0_10, %c0_11] : memref<8x1xf32, #tpu.memory_space<vmem>>, vector<8x1xf32>
    %13 = arith.mulf %6, %6 : vector<8x128xf32>
    %cst_12 = arith.constant dense<0.000000e+00> : vector<8xf32>
    %14 = vector.multi_reduction <add>, %13, %cst_12 [1] : vector<8x128xf32> to vector<8xf32>
    %15 = vector.shape_cast %14 : vector<8xf32> to vector<8x1xf32>
    %16 = arith.addf %12, %15 : vector<8x1xf32>
    %c0_13 = arith.constant 0 : index
    %c0_14 = arith.constant 0 : index
    %17 = vector.load %arg7[%c0_13, %c0_14] : memref<8x1xf32, #tpu.memory_space<vmem>>, vector<8x1xf32>
    tpu.vector_store %arg7[%c0_13, %c0_14], %16 {strides = array<i32>} : memref<8x1xf32, #tpu.memory_space<vmem>>, vector<8x1xf32>,
    %c128_i32 = arith.constant 128 : i32
    %18 = arith.muli %arg2, %c128_i32 : i32
    %19 = tpu.assume_multiple %18, 128 : i32
    %c0_15 = arith.constant 0 : index
    %c0_16 = arith.constant 0 : index
    %20 = arith.index_cast %19 : i32 to index
    %21 = vector.load %arg5[%c0_15, %c0_16, %20] : memref<1x8x128xf32, #tpu.memory_space<vmem>>, vector<1x8x128xf32>
    %22 = vector.shape_cast %21 : vector<1x8x128xf32> to vector<8x128xf32>
    %23 = vector.shape_cast %6 : vector<8x128xf32> to vector<1x8x128xf32>
    tpu.vector_store %arg5[%c0_15, %c0_16, %20], %23 {strides = array<i32>} : memref<1x8x128xf32, #tpu.memory_space<vmem>>, vector<1x8x128xf32>,
    %c0_i32_17 = arith.constant 0 : i32
    %24 = arith.cmpi eq, %arg2, %c0_i32_17 : i32
    %25 = arith.extui %24 : i1 to i32
    %c0_i32_18 = arith.constant 0 : i32
    %26 = arith.cmpi ne, %25, %c0_i32_18 : i32
    scf.if %26 {
      %c0_19 = arith.constant 0 : index
      %c0_20 = arith.constant 0 : index
      %27 = vector.load %arg6[%c0_19, %c0_20] : memref<8x1xf32, #tpu.memory_space<vmem>>, vector<8x1xf32>
      %cst_21 = arith.constant 1.562500e-02 : f32
      %28 = vector.broadcast %cst_21 : f32 to vector<8x1xf32>
      %29 = arith.mulf %27, %28 : vector<8x1xf32>
      %c0_22 = arith.constant 0 : index
      %c0_23 = arith.constant 0 : index
      %30 = vector.load %arg7[%c0_22, %c0_23] : memref<8x1xf32, #tpu.memory_space<vmem>>, vector<8x1xf32>
      %cst_24 = arith.constant 1.562500e-02 : f32
      %31 = vector.broadcast %cst_24 : f32 to vector<8x1xf32>
      %32 = arith.mulf %30, %31 : vector<8x1xf32>
      %33 = arith.mulf %29, %29 : vector<8x1xf32>
      %34 = arith.subf %32, %33 : vector<8x1xf32>
      %cst_25 = arith.constant 0.000000e+00 : f32
      %35 = vector.broadcast %cst_25 : f32 to vector<8x1xf32>
      %36 = arith.maximumf %34, %35 : vector<8x1xf32>
      %cst_26 = arith.constant 9.99999974E-6 : f32
      %37 = vector.broadcast %cst_26 : f32 to vector<8x1xf32>
      %38 = arith.addf %36, %37 : vector<8x1xf32>
      %39 = math.rsqrt %38 : vector<8x1xf32>
      %c0_27 = arith.constant 0 : index
      %c0_28 = arith.constant 0 : index
      %c0_29 = arith.constant 0 : index
      %40 = vector.load %arg5[%c0_27, %c0_28, %c0_29] : memref<1x8x128xf32, #tpu.memory_space<vmem>>, vector<1x8x128xf32>
      %41 = vector.shape_cast %40 : vector<1x8x128xf32> to vector<8x128xf32>
      %42 = vector.broadcast %29 : vector<8x1xf32> to vector<8x128xf32>
      %43 = arith.subf %41, %42 : vector<8x128xf32>
      %44 = vector.broadcast %39 : vector<8x1xf32> to vector<8x128xf32>
      %45 = arith.mulf %43, %44 : vector<8x128xf32>
      %cst_30 = arith.constant 2.000000e-01 : f32
      %46 = vector.broadcast %cst_30 : f32 to vector<8x128xf32>
      %47 = arith.mulf %46, %45 : vector<8x128xf32>
      %48 = arith.maximumf %45, %47 : vector<8x128xf32>
      %c0_31 = arith.constant 0 : index
      %c0_32 = arith.constant 0 : index
      %c0_33 = arith.constant 0 : index
      %49 = vector.load %arg5[%c0_31, %c0_32, %c0_33] : memref<1x8x128xf32, #tpu.memory_space<vmem>>, vector<1x8x128xf32>
      %50 = vector.shape_cast %49 : vector<1x8x128xf32> to vector<8x128xf32>
      %51 = vector.shape_cast %48 : vector<8x128xf32> to vector<1x8x128xf32>
      tpu.vector_store %arg5[%c0_31, %c0_32, %c0_33], %51 {strides = array<i32>} : memref<1x8x128xf32, #tpu.memory_space<vmem>>, vector<1x8x128xf32>,
    } else {
    }
    return
  }
  func.func @transform_0(%arg0: i32, %arg1: i32, %arg2: i32) -> (i32, i32, i32) {
    %c0_i32 = arith.constant 0 : i32
    %c0_i32_0 = arith.constant 0 : i32
    return %arg0, %c0_i32, %arg2 : i32, i32, i32
  }
  func.func @transform_1(%arg0: i32, %arg1: i32, %arg2: i32) -> (i32, i32) {
    %c0_i32 = arith.constant 0 : i32
    %c0_i32_0 = arith.constant 0 : i32
    return %arg1, %c0_i32 : i32, i32
  }
  func.func @transform_2(%arg0: i32, %arg1: i32, %arg2: i32) -> (i32, i32, i32) {
    %c0_i32 = arith.constant 0 : i32
    %c0_i32_0 = arith.constant 0 : i32
    return %arg0, %arg1, %c0_i32 : i32, i32, i32
  }
}

</mosaic_0001>

<bundles_post_ra>
// kernel: tpu_custom_call.1
= control target key start
LH: loop header
LB: loop body
LE: loop exit
PB: predicated region body
PF: predicated region fallthrough
CT: control target
= control target key end

     0   :  { %7 = vsyncpa [#allocation5], 0  ;;  %s905_s0 = inlined_call_operand.hbm [shape: bf16[2,64,128], index: 0, kind: input, shape index: {}]   ;;  %s906_s1 = inlined_call_operand.hbm [shape: bf16[8,64], index: 1, kind: input, shape index: {}]   ;;  %s907_s2 = inlined_call_operand.hbm [shape: f32[2,8,128], index: 2, kind: output, shape index: {}]  }
   0x1   :  { %9 = vsyncpa [#allocation5 + $0x1], 0 }
   0x2   :  { %10 = vsyncpa [#allocation8], 0 }
   0x3   :  { %11 = vsyncpa [#allocation6], 0  ;;  %s706_s9 = smov 0   ;;  %s708_s10 = smov 0  }
   0x4   :  { %s710_s11 = smov 0   ;;  %s712_s12 = smov 0  }
   0x5   :  { %s714_s13 = smov 0   ;;  %s716_s14 = smov 0  }
   0x6 LB: > { %s419_s15 = sadd.s32 4294967295, %s681_s14   ;;  %s45_s16 = sadd.s32 1, %s669_s11  ;;  %s681_s14 = sphi %s716_s14, %s17_s14   ;;  %s677_s13 = sphi %s714_s13, %s932_s13   ;;  %s673_s12 = sphi %s712_s12, %s931_s12   ;;  %s669_s11 = sphi %s710_s11, %s930_s11   ;;  %s665_s10 = sphi %s708_s10, %s929_s10   ;;  %s661_s9 = sphi %s706_s9, %s928_s9  }
   0x7   : > { %p52_p0 = scmp.ne.s32.totalorder %s669_s11, %s665_s10  ;;  %p53_p1 = scmp.eq.s32.totalorder %s681_s14, 0 }
   0x8   : > { %p58_p2 = scmp.ne.s32.totalorder %s665_s10, %s661_s9  ;;  %p740_p3 = scmp.eq.s32.totalorder %s419_s15, 0 }
   0x9   : > { %p744_p4 = por %p53_p1, %p52_p0  ;;  %p110_p5 = scmp.eq.s32.totalorder %s419_s15, 1 }
   0xa   : > { %s914_s17 = scalar_select %p740_p3, 1, 0 }
   0xb   : > { %p750_p6 = por %p740_p3, %p58_p2  ;;  %p420_p7 = scmp.ge.s32.totalorder %s681_s14, 1 }
   0xc   : > { %p755_p8 = por %p110_p5, %p52_p0  ;;  %p123_p9 = scmp.lt.s32.totalorder %s681_s14, 3 }
   0xd   : > { %s916_s19 = scalar_select %p750_p6, 1, 0 }
   0xe   : > { %s917_s20 = scalar_select %p755_p8, 1, 0 }
   0xf   : > { %p760_p10 = pnand %p420_p7, %p123_p9  ;;  %s683_s22 = smov [#allocation7]  }
  0x10   : > { %s138_s23 = sshll.u32 %s683_s22, 4  ;;  %p472_p12 = scmp.lt.s32.totalorder %s681_s14, 2  ;;  %s139_s23 = int_to_ptr.vmem [resolvable:$true] %s138_s23 }
  0x11   : > { %s918_s21 = scalar_select %p760_p10, 1, 0 }
  0x12   : > { %p463_p11 = pneg %p760_p10  ;;  %s149_s24 = sand.u32 1, %s669_s11  }
  0x13   : > { %p776_p0 = pnand %p472_p12, %p744_p4  ;;  %s537_s29 = scalar_lea.hbm %s906_s1, 64 }
  0x14   : > { %p770_p13 = pnand %p463_p11, %p740_p3  ;;  %p538_p1 = scmp.ne.s32.totalorder %s906_s1, %s537_s29 }
  0x15   : > { %s920_s26 = scalar_select %p776_p0, 1, 0 }
  0x16   : > { %p539_p2 = pneg %p770_p13  ;;  %p544_p9 = scmp.lt.u32.totalorder %s537_s29, %s906_s1 }
  0x18   : > { %p540_p5 = pnand %p539_p2, %p538_p1 }
  0x1a   : > { %p541_p7 = pneg %p540_p5 }
  0x1c   : > { %p546_p4 = pnand %p544_p9, %p541_p7 }
  0x1e   : > { %549 = shalt.err (!%p546_p4)
}
  0x1f   : > { %s550_s6 = scalar_lea.vmem %s139_s23, 64  ;;  %p558_p3 = scmp.lt.s32.totalorder %s139_s23, %s139_s23 }
  0x20   : > { %p551_p11 = scmp.ne.s32.totalorder %s139_s23, %s550_s6  ;;  %p559_p6 = scmp.lt.s32.totalorder %s550_s6, %s550_s6 }
  0x22   : > { %p553_p12 = pnand %p551_p11, %p539_p2  ;;  %p560_p10 = por %p559_p6, %p558_p3 }
  0x24   : > { %p554_p8 = pneg %p553_p12 }
  0x26   : > { %p561_p0 = pnand %p560_p10, %p554_p8 }
  0x28   : > { %564 = shalt.err (!%p561_p0)
}
  0x29   : > { %466 = dma.hbm_to_vmem [thread:$0]  (!%p770_p13), %s906_s1, 64, %s139_s23, [#allocation8]  }
  0x2a   : > { %s36_s9 = sadd.s32 1, %s677_s13  ;;  %s423_s15 = sshll.u32 %s149_s24, 5 }
  0x2b   : > { %p38_p1 = scmp.ge.s32.totalorder %s36_s9, 2  ;;  %s437_s18 = sshll.u32 %s677_s13, 9 }
  0x2c   : > { %s153_s22 = scalar_lea.vmem [#allocation4], %s423_s15  ;;  %s805_s29 = scalar_lea.hbm %s905_s0, %s437_s18 }
  0x2d   : > { %s161_s27 = sshll.u32 %s153_s22, 4  ;;  %s934_s9 = smov (%p38_p1, %s36_s9), 0  ;;  %s807_s27 = int_to_ptr.vmem [resolvable:$true] %s161_s27 }
  0x2e   : > { %s40_s23 = ssub.s32 %s677_s13, %s934_s9  ;;  %s817_s3 = scalar_lea.sflag [#allocation5], %s149_s24 }
  0x2f   : > { %p811_p3 = scmp.eq.s32.totalorder %s40_s23, 0  ;;  %s565_s4 = scalar_lea.hbm %s805_s29, 512 }
  0x30   : > { %p566_p6 = scmp.ne.s32.totalorder %s805_s29, %s565_s4  ;;  %p922_p8 = scmp.ne.s32.totalorder %s920_s26, 0 }
  0x31   : > { %s570_s7 = scalar_lea.hbm %s905_s0, 1024  ;;  %p571_p2 = scmp.lt.u32.totalorder %s805_s29, %s905_s0 }
  0x32   : > { %p567_p10 = pneg %p922_p8  ;;  %p572_p5 = scmp.lt.u32.totalorder %s570_s7, %s565_s4 }
  0x33   : > { %p574_p9 = scmp.lt.u32.totalorder %s565_s4, %s805_s29 }
  0x34   : > { %p568_p13 = pnand %p567_p10, %p566_p6  ;;  %p573_p7 = por %p572_p5, %p571_p2 }
  0x36   : > { %p569_p0 = pneg %p568_p13  ;;  %p575_p4 = por %p574_p9, %p573_p7 }
  0x38   : > { %p576_p11 = pnand %p575_p4, %p569_p0 }
  0x3a   : > { %579 = shalt.err (!%p576_p11)
}
  0x3b   : > { %s580_s24 = scalar_lea.vmem %s807_s27, 512  ;;  %s684_s18 = smov [#allocation4]  }
  0x3c   : > { %p581_p12 = scmp.ne.s32.totalorder %s807_s27, %s580_s24  ;;  %s585_s22 = sshll.u32 %s684_s18, 4  ;;  %s586_s22 = int_to_ptr.vmem [resolvable:$false] %s585_s22 }
  0x3d   : > { %s587_s25 = scalar_lea.vmem %s586_s22, 1024  ;;  %p588_p13 = scmp.lt.s32.totalorder %s807_s27, %s586_s22 }
  0x3e   : > { %p583_p1 = pnand %p581_p12, %p567_p10  ;;  %p589_p2 = scmp.lt.s32.totalorder %s587_s25, %s580_s24 }
  0x40   : > { %p584_p6 = pneg %p583_p1  ;;  %p590_p5 = por %p589_p2, %p588_p13 }
  0x42   : > { %p591_p7 = pnand %p590_p5, %p584_p6 }
  0x44   : > { %594 = shalt.err (!%p591_p7)
}
  0x45   : > { %s685_s28 = smov 64   ;;  %s686_s23 = smov 4  }
  0x46   : > { %470 = dma.hbm_to_vmem [thread:$0]  (!%p922_p8), %s805_s29, 512, %s807_s27, %s817_s3, %s685_s28, %s685_s28, %s686_s23  }
  0x47   : > { %s850_s4 = scalar_select %p811_p3, %s669_s11, %s45_s16  }
  0x48   : > { %p923_p10 = scmp.ne.s32.totalorder %s918_s21, 0 }
  0x49   : > { %s175_s5 = sand.u32 (!%p923_p10), 1, %s665_s10   ;;  %p924_p0 = scmp.ne.s32.totalorder (!%p923_p10), %s916_s19, 0 }
  0x4a   : > { %173 = sbr.rel (%p923_p10) target bundleno = 639 (0x27f), region = 28  ;;  %s427_s6 = sshll.u32 (!%p923_p10), %s175_s5, 5 }
  0x4b   : > { %s176_s7 = scalar_lea.sflag (!%p923_p10), [#allocation5], %s175_s5  ;;  %s179_s8 = scalar_lea.vmem (!%p923_p10), [#allocation4], %s427_s6 }
  0x51   : > { %648 = dma.done.wait (%p924_p0), %s176_s7, 512  }
  0x52   : > { %650 = vsyncadd (%p924_p0), %s176_s7, 4294966784  ;;  %p925_p8 = scmp.ne.s32.totalorder %s914_s17, 0 }
  0x54   : > { %652 = dma.done.wait (%p925_p8), [#allocation8], 64  }
  0x55   : > { %654 = vsyncadd (%p925_p8), [#allocation8], 4294967232  ;;  %v687_v0 = vmov 0.0   ;;  %vm688_vm0 = vmmov 0   ;;  %v531_v1 = vld [vmem:[%s179_s8] sm:$0xff]   ;;  %v532_v2 = vld [vmem:[%s179_s8 + $0x8] sm:$0xff]  }
  0x56   : > { %443 = vmatprep.subr.bf16.mxu0 %v687_v0  ;;  %451 = vmatprep.mubr.msk.bf16.mxu0 %vm688_vm0, %v687_v0  ;;  %v533_v3 = vld [vmem:[%s179_s8 + $0x10] sm:$0xff]   ;;  %v534_v4 = vld [vmem:[%s179_s8 + $0x18] sm:$0xff]   ;;  %v207_v5 = vld [vmem:[#allocation7] sm:$0xf]  ;;  %vm240_vm1 = vcmask 523264   ;;  %vm204_vm2 = vcmask 7168  }
  0x57   : > { %444 = vmatpush3.bf16.msra.mxu0 %v531_v1  ;;  %205 = vst.msk [vmem:[#allocation2] sm:$0xff] %vm204_vm2, %v687_v0  ;;  %206 = vst.msk [vmem:[#allocation3] sm:$0xff] %vm204_vm2, %v687_v0  ;;  %v689_v11 = vmov 0   ;;  %s434_s16 = sshll.u32 %s673_s12, 7  ;;  %s690_s17 = smov [#allocation9]  }
  0x58   : > { %445 = vmatprep.subr.bf16.mxu0 %v687_v0  ;;  %529 = vset.pattern.permute.xlu1 %v689_v11  ;;  %s339_s19 = sshll.u32 %s690_s17, 4  ;;  %s337_s27 = scalar_lea.hbm %s907_s2, %s434_s16  ;;  %s340_s19 = int_to_ptr.vmem [resolvable:$true] %s339_s19 }
  0x59   : > { %530 = vset.pattern.permute.xlu0 %v689_v11  ;;  %s595_s29 = scalar_lea.vmem %s340_s19, 128  ;;  %p926_p9 = scmp.ne.s32.totalorder %s917_s20, 0 }
  0x5a   : > { %p596_p3 = scmp.ne.s32.totalorder %s340_s19, %s595_s29  ;;  %p602_p12 = scmp.lt.s32.totalorder %s340_s19, %s340_s19 }
  0x5b   : > { %446 = vmatpush3.bf16.msra.mxu0 %v532_v2  ;;  %p603_p1 = scmp.lt.s32.totalorder %s595_s29, %s595_s29 }
  0x5c   : > { %447 = vmatprep.subr.bf16.mxu0 %v687_v0  ;;  %p597_p4 = pnand %p596_p3, %p926_p9 }
  0x5d   : > { %p604_p6 = por %p603_p1, %p602_p12 }
  0x5e   : > { %v284_v12 = vld [vmem:[#allocation2] sm:$0xff]  ;;  %v290_v15 = vld [vmem:[#allocation3] sm:$0xff]  ;;  %p598_p11 = pneg %p597_p4 }
  0x5f   : > { %448 = vmatpush3.bf16.msra.mxu0 %v533_v3 }
  0x60   : > { %449 = vmatprep.subr.bf16.mxu0 %v687_v0  ;;  %p605_p13 = pnand %p604_p6, %p598_p11 }
  0x63   : > { %450 = vmatpush3.bf16.msra.mxu0 %v534_v4 }
  0x66   : > { %452 = vmatmul.mubr.msk.bf16.vlgmr.msra.gmra.mrb[0].mxu0 %vm240_vm1, %v207_v5 }
 0x139   : > { %v278_v6 = vpop.f32.mrb[0].mxu0 }
 0x13a   : > { %285 = vadd.xlane.f32.xlu0 %v278_v6  ;;  %v453_v7 = vpop.f32.mrb[1].mxu0  ;;  %v291_v10 = vmul.f32 %v278_v6, %v278_v6 }
 0x13b   : > { %v281_v8 = vpop.f32.mrb[2].mxu0 }
 0x13c   : > { %v454_v9 = vpop.f32.mrb[3].mxu0 }
 0x13e   : > { %292 = vadd.xlane.f32.xlu0 %v291_v10 }
 0x1c7   : > { %v286_v13 = vpop.xlane.xlu0 %285 }
 0x1c8   : > { %v287_v14 = vadd.f32 %v286_v13, %v284_v12 }
 0x1ca   : > { %289 = vst.msk [vmem:[#allocation2] sm:$0xff] %vm204_vm2, %v287_v14 }
 0x1cb   : > { %v293_v16 = vpop.xlane.xlu0 %292 }
 0x1cc   : > { %v294_v17 = vadd.f32 %v293_v16, %v290_v15 }
 0x1ce   : > { %295 = vst.msk [vmem:[#allocation3] sm:$0xff] %vm204_vm2, %v294_v17 }
 0x1d1   : > { %v304_v18 = vld [vmem:[#allocation2] sm:$0xff] }
 0x1d2   : > { %v305_v19 = vmul.f32 0.015625, %v304_v18 }
 0x1d4   : > { %316 = vperm.xlu1 %529, %v305_v19   ;;  %v308_v22 = vmul.f32 %v305_v19, %v305_v19 }
 0x1d5   : > { %v306_v20 = vld [vmem:[#allocation3] sm:$0xff] }
 0x1d6   : > { %v307_v21 = vmul.f32 0.015625, %v306_v20 }
 0x1d8   : > { %v309_v23 = vsub.f32 %v307_v21, %v308_v22 }
 0x1da   : > { %v310_v24 = vmax.f32 %v309_v23, 0.0 }
 0x1dc   : > { %v311_v25 = vadd.f32 1e-05, %v310_v24 }
 0x1de   : > { %535 = vrsqrt.f32 %v311_v25 }
 0x1e8   : > { %v536_v26 = vpop.eup %535 }
 0x1e9   : > { %322 = vperm.xlu1 %529, %v536_v26  }
 0x253   : > { %v317_v27 = vpop.permute.xlu1 %316 }
 0x254   : > { %v319_v28 = vsub.f32 %v278_v6, %v317_v27 }
 0x268   : > { %v323_v29 = vpop.permute.xlu1 %322 }
 0x269   : > { %v325_v30 = vmul.f32 %v323_v29, %v319_v28 }
 0x26b   : > { %v326_v31 = vmul.f32 0.2, %v325_v30 }
 0x26d   : > { %v327_v32 = vmax.f32 %v325_v30, %v326_v31 }
 0x26f   : > { %328 = vst [vmem:[#allocation9] sm:$0xff] %v327_v32 }
 0x270   : > { %608 = shalt.err (!%p605_p13)
}
 0x271   : > { %s609_s12 = scalar_lea.hbm %s337_s27, 128  ;;  %s613_s15 = scalar_lea.hbm %s907_s2, 256 }
 0x272   : > { %p610_p2 = scmp.ne.s32.totalorder %s337_s27, %s609_s12  ;;  %p614_p10 = scmp.lt.u32.totalorder %s337_s27, %s907_s2 }
 0x273   : > { %p615_p0 = scmp.lt.u32.totalorder %s613_s15, %s609_s12  ;;  %p617_p3 = scmp.lt.u32.totalorder %s609_s12, %s337_s27 }
 0x274   : > { %p611_p5 = pnand %p610_p2, %p926_p9 }
 0x275   : > { %p616_p8 = por %p615_p0, %p614_p10 }
 0x276   : > { %p612_p7 = pneg %p611_p5 }
 0x277   : > { %p618_p4 = por %p617_p3, %p616_p8 }
 0x279   : > { %p619_p11 = pnand %p618_p4, %p612_p7 }
 0x27b   : > { %622 = shalt.err (!%p619_p11)
}
 0x27c   : > { %461 = dma.vmem_to_hbm [thread:$0]  (%p926_p9), %s340_s19, 128, %s337_s27, [#allocation6]  }
 0x27d   : > { %656 = dma.done.wait (%p926_p9), [#allocation6], 128  }
 0x27e   : > { %658 = vsyncadd (%p926_p9), [#allocation6], 4294967168 }
 0x27f PF: > { %s17_s14 = sadd.s32 1, %s681_s14   ;;  %s927_s22 = smov %s934_s9 }
 0x280   : > { %p14_p12 = scmp.ge.s32.totalorder %s17_s14, 4   ;;  %s928_s9 = smov %s665_s10 }
 0x281   : > { %s929_s10 = smov %s669_s11  ;;  %s930_s11 = smov %s850_s4 }
 0x282   : > { %s931_s12 = smov %s677_s13  ;;  %s932_s13 = smov %s927_s22 }
 0x283   :  { %16 = sbr.rel (!%p14_p12) target bundleno = 6 (0x6), region = 80 }
 0x28a   :  { %352 = vsyncpa [#allocation5], 1 }
 0x28b   :  { %354 = vsyncpa [#allocation5 + $0x1], 1 }
 0x28c   :  { %355 = vsyncpa [#allocation8], 1 }
 0x28d   :  { %356 = vsyncpa [#allocation6], 1 }
 0x28e   :  { %358 = vsyncpa [#allocation6 + $0x1], 1 }

// kernel: tpu_custom_call.1
= control target key start
LH: loop header
LB: loop body
LE: loop exit
PB: predicated region body
PF: predicated region fallthrough
CT: control target
= control target key end

     0   :  { %7 = vsyncpa [#allocation5], 0  ;;  %s966_s0 = inlined_call_operand.hbm [shape: bf16[2,64,128], index: 0, kind: input, shape index: {}]   ;;  %s967_s1 = inlined_call_operand.hbm [shape: bf16[8,64], index: 1, kind: input, shape index: {}]   ;;  %s968_s2 = inlined_call_operand.hbm [shape: f32[2,8,128], index: 2, kind: output, shape index: {}]  }
   0x1   :  { %9 = vsyncpa [#allocation5 + $0x1], 0 }
   0x2   :  { %10 = vsyncpa [#allocation8], 0 }
   0x3   :  { %11 = vsyncpa [#allocation6], 0 }
   0x4   :  { %13 = vsyncpa [#allocation6 + $0x1], 0  ;;  %s742_s9 = smov 0   ;;  %s744_s10 = smov 0  }
   0x5   :  { %s746_s11 = smov 0   ;;  %s748_s12 = smov 0  }
   0x6   :  { %s750_s13 = smov 0   ;;  %s752_s14 = smov 0  }
   0x7 LB: > { %s448_s15 = sadd.s32 4294967295, %s717_s14   ;;  %s449_s16 = sadd.s32 4294967294, %s717_s14   ;;  %s717_s14 = sphi %s752_s14, %s19_s14   ;;  %s713_s13 = sphi %s750_s13, %s996_s13   ;;  %s709_s12 = sphi %s748_s12, %s995_s12   ;;  %s705_s11 = sphi %s746_s11, %s994_s11   ;;  %s701_s10 = sphi %s744_s10, %s993_s10   ;;  %s697_s9 = sphi %s742_s9, %s992_s9  }
   0x8   : > { %s47_s17 = sadd.s32 1, %s705_s11  ;;  %p54_p0 = scmp.ne.s32.totalorder %s705_s11, %s701_s10 }
   0x9   : > { %p55_p1 = scmp.eq.s32.totalorder %s717_s14, 0  ;;  %p60_p2 = scmp.ne.s32.totalorder %s701_s10, %s697_s9 }
   0xa   : > { %p780_p3 = scmp.eq.s32.totalorder %s448_s15, 0  ;;  %p112_p4 = scmp.eq.s32.totalorder %s448_s15, 1 }
   0xb   : > { %p784_p5 = por %p55_p1, %p54_p0  ;;  %p118_p6 = scmp.eq.s32.totalorder %s449_s16, 1 }
   0xc   : > { %s975_s18 = scalar_select %p780_p3, 1, 0 }
   0xd   : > { %p790_p7 = por %p780_p3, %p60_p2  ;;  %p794_p8 = por %p112_p4, %p54_p0 }
   0xe   : > { %p798_p9 = por %p118_p6, %p60_p2  ;;  %p450_p10 = scmp.ge.s32.totalorder %s717_s14, 1 }
   0xf   : > { %s977_s20 = scalar_select %p790_p7, 1, 0 }
  0x10   : > { %s978_s21 = scalar_select %p794_p8, 1, 0 }
  0x11   : > { %s979_s22 = scalar_select %p798_p9, 1, 0 }
  0x12   : > { %p125_p11 = scmp.lt.s32.totalorder %s717_s14, 3  ;;  %s719_s24 = smov [#allocation7]  }
  0x13   : > { %s140_s25 = sshll.u32 %s719_s24, 4  ;;  %p508_p1 = scmp.lt.s32.totalorder %s717_s14, 2  ;;  %s141_s25 = int_to_ptr.vmem [resolvable:$true] %s140_s25 }
  0x14   : > { %p805_p13 = pnand %p450_p10, %p125_p11  ;;  %s38_s28 = sadd.s32 1, %s713_s13 }
  0x15   : > { %p814_p4 = pnand %p508_p1, %p784_p5  ;;  %p825_p6 = scmp.ge.s32.totalorder %s38_s28, 2 }
  0x16   : > { %s980_s23 = scalar_select %p805_p13, 1, 0 }
  0x17   : > { %p495_p0 = pneg %p805_p13  ;;  %s151_s30 = sand.u32 1, %s705_s11  }
  0x18   : > { %s981_s26 = scalar_select %p814_p4, 1, 0 }
  0x19   : > { %p820_p2 = pnand %p495_p0, %p780_p3  ;;  %s573_s5 = scalar_lea.hbm %s967_s1, 64 }
  0x1a   : > { %s983_s29 = scalar_select %p825_p6, 1, 0 }
  0x1b   : > { %p574_p5 = scmp.ne.s32.totalorder %s967_s1, %s573_s5  ;;  %p575_p10 = pneg %p820_p2 }
  0x1c   : > { %p580_p0 = scmp.lt.u32.totalorder %s573_s5, %s967_s1 }
  0x1d   : > { %p576_p11 = pnand %p575_p10, %p574_p5 }
  0x1f   : > { %p577_p1 = pneg %p576_p11 }
  0x21   : > { %p582_p12 = pnand %p580_p0, %p577_p1 }
  0x23   : > { %585 = shalt.err (!%p582_p12)
}
  0x24   : > { %s586_s16 = scalar_lea.vmem %s141_s25, 64  ;;  %p594_p7 = scmp.lt.s32.totalorder %s141_s25, %s141_s25 }
  0x25   : > { %p587_p9 = scmp.ne.s32.totalorder %s141_s25, %s586_s16  ;;  %p595_p13 = scmp.lt.s32.totalorder %s586_s16, %s586_s16 }
  0x27   : > { %p589_p8 = pnand %p587_p9, %p575_p10  ;;  %p596_p4 = por %p595_p13, %p594_p7 }
  0x29   : > { %p590_p3 = pneg %p589_p8 }
  0x2b   : > { %p597_p6 = pnand %p596_p4, %p590_p3 }
  0x2d   : > { %600 = shalt.err (!%p597_p6)
}
  0x2e   : > { %498 = dma.hbm_to_vmem [thread:$0]  (!%p820_p2), %s967_s1, 64, %s141_s25, [#allocation8]  }
  0x2f   : > { %p984_p9 = scmp.ne.s32.totalorder %s983_s29, 0  ;;  %s453_s3 = sshll.u32 %s151_s30, 5 }
  0x30   : > { %s469_s5 = sshll.u32 %s713_s13, 9  ;;  %s155_s8 = scalar_lea.vmem [#allocation4], %s453_s3 }
  0x31   : > { %s998_s28 = smov (%p984_p9, %s38_s28), 0  ;;  %s856_s7 = scalar_lea.hbm %s966_s0, %s469_s5 }
  0x32   : > { %s42_s4 = ssub.s32 %s713_s13, %s998_s28  ;;  %s163_s15 = sshll.u32 %s155_s8, 4  ;;  %s863_s15 = int_to_ptr.vmem [resolvable:$true] %s163_s15 }
  0x33   : > { %p45_p3 = scmp.eq.s32.totalorder %s42_s4, 0  ;;  %s865_s29 = scalar_lea.sflag [#allocation5], %s151_s30 }
  0x34   : > { %s601_s16 = scalar_lea.hbm %s856_s7, 512  ;;  %p985_p8 = scmp.ne.s32.totalorder %s981_s26, 0 }
  0x35   : > { %s861_s25 = scalar_select %p45_p3, %s705_s11, %s47_s17  }
  0x36   : > { %p602_p7 = scmp.ne.s32.totalorder %s856_s7, %s601_s16  ;;  %p603_p12 = pneg %p985_p8 }
  0x37   : > { %s606_s3 = scalar_lea.hbm %s966_s0, 1024  ;;  %p607_p2 = scmp.lt.u32.totalorder %s856_s7, %s966_s0 }
  0x38   : > { %p604_p13 = pnand %p603_p12, %p602_p7  ;;  %p608_p6 = scmp.lt.u32.totalorder %s606_s3, %s601_s16 }
  0x39   : > { %p610_p10 = scmp.lt.u32.totalorder %s601_s16, %s856_s7 }
  0x3a   : > { %p605_p4 = pneg %p604_p13  ;;  %p609_p5 = por %p608_p6, %p607_p2 }
  0x3c   : > { %p611_p11 = por %p610_p10, %p609_p5 }
  0x3e   : > { %p612_p1 = pnand %p611_p11, %p605_p4 }
  0x40   : > { %615 = shalt.err (!%p612_p1)
}
  0x41   : > { %s616_s17 = scalar_lea.vmem %s863_s15, 512  ;;  %s720_s30 = smov [#allocation4]  }
  0x42   : > { %p617_p0 = scmp.ne.s32.totalorder %s863_s15, %s616_s17  ;;  %s621_s27 = sshll.u32 %s720_s30, 4  ;;  %s622_s27 = int_to_ptr.vmem [resolvable:$false] %s621_s27 }
  0x43   : > { %s623_s6 = scalar_lea.vmem %s622_s27, 1024  ;;  %p624_p7 = scmp.lt.s32.totalorder %s863_s15, %s622_s27 }
  0x44   : > { %p619_p9 = pnand %p617_p0, %p603_p12  ;;  %p625_p13 = scmp.lt.s32.totalorder %s623_s6, %s616_s17 }
  0x46   : > { %p620_p3 = pneg %p619_p9  ;;  %p626_p2 = por %p625_p13, %p624_p7 }
  0x48   : > { %p627_p6 = pnand %p626_p2, %p620_p3 }
  0x4a   : > { %630 = shalt.err (!%p627_p6)
}
  0x4b   : > { %s721_s8 = smov 64   ;;  %s722_s16 = smov 4  }
  0x4c   : > { %502 = dma.hbm_to_vmem [thread:$0]  (!%p985_p8), %s856_s7, 512, %s863_s15, %s865_s29, %s721_s8, %s721_s8, %s722_s16  }
  0x4d   : > { %p986_p12 = scmp.ne.s32.totalorder %s980_s23, 0 }
  0x4e   : > { %s896_s19 = sand.u32 (!%p986_p12), 1, %s701_s10   ;;  %p987_p4 = scmp.ne.s32.totalorder (!%p986_p12), %s977_s20, 0 }
  0x4f   : > { %175 = sbr.rel (%p986_p12) target bundleno = 642 (0x282), region = 28  ;;  %s457_s24 = sshll.u32 (!%p986_p12), %s896_s19, 5 }
  0x50   : > { %s178_s3 = scalar_lea.sflag (!%p986_p12), [#allocation5], %s896_s19  ;;  %s181_s4 = scalar_lea.vmem (!%p986_p12), [#allocation4], %s457_s24 }
  0x56   : > { %684 = dma.done.wait (%p987_p4), %s178_s3, 512  }
  0x57   : > { %686 = vsyncadd (%p987_p4), %s178_s3, 4294966784  ;;  %p988_p5 = scmp.ne.s32.totalorder %s975_s18, 0 }
  0x59   : > { %688 = dma.done.wait (%p988_p5), [#allocation8], 64  }
  0x5a   : > { %690 = vsyncadd (%p988_p5), [#allocation8], 4294967232  ;;  %v723_v0 = vmov 0.0   ;;  %vm724_vm0 = vmmov 0   ;;  %v567_v1 = vld [vmem:[%s181_s4] sm:$0xff]   ;;  %v568_v2 = vld [vmem:[%s181_s4 + $0x8] sm:$0xff]  }
  0x5b   : > { %475 = vmatprep.subr.bf16.mxu0 %v723_v0  ;;  %483 = vmatprep.mubr.msk.bf16.mxu0 %vm724_vm0, %v723_v0  ;;  %v569_v3 = vld [vmem:[%s181_s4 + $0x10] sm:$0xff]   ;;  %v570_v4 = vld [vmem:[%s181_s4 + $0x18] sm:$0xff]   ;;  %v214_v5 = vld [vmem:[#allocation7] sm:$0xf]  ;;  %vm247_vm1 = vcmask 523264   ;;  %vm211_vm2 = vcmask 7168  }
  0x5c   : > { %476 = vmatpush3.bf16.msra.mxu0 %v567_v1  ;;  %212 = vst.msk [vmem:[#allocation2] sm:$0xff] %vm211_vm2, %v723_v0  ;;  %213 = vst.msk [vmem:[#allocation3] sm:$0xff] %vm211_vm2, %v723_v0  ;;  %v725_v11 = vmov 0   ;;  %s459_s18 = sshll.u32 %s896_s19, 3  ;;  %s466_s20 = sshll.u32 %s709_s12, 7 }
  0x5d   : > { %477 = vmatprep.subr.bf16.mxu0 %v723_v0  ;;  %565 = vset.pattern.permute.xlu1 %v725_v11  ;;  %s205_s23 = scalar_lea.vmem [#allocation9], %s459_s18  ;;  %s917_s29 = scalar_lea.hbm %s968_s2, %s466_s20 }
  0x5e   : > { %566 = vset.pattern.permute.xlu0 %v725_v11  ;;  %s351_s26 = sshll.u32 %s205_s23, 4  ;;  %s337_s5 = scalar_lea.sflag [#allocation6], %s896_s19  ;;  %s919_s26 = int_to_ptr.vmem [resolvable:$true] %s351_s26 }
  0x5f   : > { %s631_s17 = scalar_lea.vmem %s919_s26, 128  ;;  %p989_p10 = scmp.ne.s32.totalorder %s978_s21, 0 }
  0x60   : > { %478 = vmatpush3.bf16.msra.mxu0 %v568_v2  ;;  %p632_p8 = scmp.ne.s32.totalorder %s919_s26, %s631_s17  ;;  %s726_s12 = smov [#allocation9]  }
  0x61   : > { %479 = vmatprep.subr.bf16.mxu0 %v723_v0  ;;  %s635_s30 = sshll.u32 %s726_s12, 4  ;;  %s636_s30 = int_to_ptr.vmem [resolvable:$false] %s635_s30 }
  0x62   : > { %p633_p11 = pnand %p632_p8, %p989_p10  ;;  %s637_s27 = scalar_lea.vmem %s636_s30, 256 }
  0x63   : > { %v291_v12 = vld [vmem:[#allocation2] sm:$0xff]  ;;  %v297_v15 = vld [vmem:[#allocation3] sm:$0xff]  ;;  %p638_p0 = scmp.lt.s32.totalorder %s919_s26, %s636_s30  ;;  %p639_p9 = scmp.lt.s32.totalorder %s637_s27, %s631_s17 }
  0x64   : > { %480 = vmatpush3.bf16.msra.mxu0 %v569_v3  ;;  %p634_p1 = pneg %p633_p11 }
  0x65   : > { %481 = vmatprep.subr.bf16.mxu0 %v723_v0  ;;  %p640_p3 = por %p639_p9, %p638_p0 }
  0x67   : > { %p641_p7 = pnand %p640_p3, %p634_p1 }
  0x68   : > { %482 = vmatpush3.bf16.msra.mxu0 %v570_v4 }
  0x6b   : > { %484 = vmatmul.mubr.msk.bf16.vlgmr.msra.gmra.mrb[0].mxu0 %vm247_vm1, %v214_v5 }
 0x13e   : > { %v285_v6 = vpop.f32.mrb[0].mxu0 }
 0x13f   : > { %292 = vadd.xlane.f32.xlu0 %v285_v6  ;;  %v485_v7 = vpop.f32.mrb[1].mxu0  ;;  %v298_v10 = vmul.f32 %v285_v6, %v285_v6 }
 0x140   : > { %v288_v8 = vpop.f32.mrb[2].mxu0 }
 0x141   : > { %v486_v9 = vpop.f32.mrb[3].mxu0 }
 0x143   : > { %299 = vadd.xlane.f32.xlu0 %v298_v10 }
 0x1cc   : > { %v293_v13 = vpop.xlane.xlu0 %292 }
 0x1cd   : > { %v294_v14 = vadd.f32 %v293_v13, %v291_v12 }
 0x1cf   : > { %296 = vst.msk [vmem:[#allocation2] sm:$0xff] %vm211_vm2, %v294_v14 }
 0x1d0   : > { %v300_v16 = vpop.xlane.xlu0 %299 }
 0x1d1   : > { %v301_v17 = vadd.f32 %v300_v16, %v297_v15 }
 0x1d3   : > { %302 = vst.msk [vmem:[#allocation3] sm:$0xff] %vm211_vm2, %v301_v17 }
 0x1d6   : > { %v311_v18 = vld [vmem:[#allocation2] sm:$0xff] }
 0x1d7   : > { %v312_v19 = vmul.f32 0.015625, %v311_v18 }
 0x1d9   : > { %323 = vperm.xlu1 %565, %v312_v19   ;;  %v315_v22 = vmul.f32 %v312_v19, %v312_v19 }
 0x1da   : > { %v313_v20 = vld [vmem:[#allocation3] sm:$0xff] }
 0x1db   : > { %v314_v21 = vmul.f32 0.015625, %v313_v20 }
 0x1dd   : > { %v316_v23 = vsub.f32 %v314_v21, %v315_v22 }
 0x1df   : > { %v317_v24 = vmax.f32 %v316_v23, 0.0 }
 0x1e1   : > { %v318_v25 = vadd.f32 1e-05, %v317_v24 }
 0x1e3   : > { %571 = vrsqrt.f32 %v318_v25 }
 0x1ed   : > { %v572_v26 = vpop.eup %571 }
 0x1ee   : > { %329 = vperm.xlu1 %565, %v572_v26  }
 0x258   : > { %v324_v27 = vpop.permute.xlu1 %323 }
 0x259   : > { %v326_v28 = vsub.f32 %v285_v6, %v324_v27 }
 0x26d   : > { %v330_v29 = vpop.permute.xlu1 %329 }
 0x26e   : > { %v332_v30 = vmul.f32 %v330_v29, %v326_v28 }
 0x270   : > { %v333_v31 = vmul.f32 0.2, %v332_v30 }
 0x272   : > { %v334_v32 = vmax.f32 %v332_v30, %v333_v31 }
 0x274   : > { %335 = vst [vmem:[%s205_s23] sm:$0xff] %v334_v32 }
 0x275   : > { %644 = shalt.err (!%p641_p7)
}
 0x276   : > { %s645_s6 = scalar_lea.hbm %s917_s29, 128  ;;  %s649_s19 = scalar_lea.hbm %s968_s2, 256 }
 0x277   : > { %p646_p13 = scmp.ne.s32.totalorder %s917_s29, %s645_s6  ;;  %p650_p12 = scmp.lt.u32.totalorder %s917_s29, %s968_s2 }
 0x278   : > { %p651_p4 = scmp.lt.u32.totalorder %s649_s19, %s645_s6  ;;  %p653_p8 = scmp.lt.u32.totalorder %s645_s6, %s917_s29 }
 0x279   : > { %p647_p2 = pnand %p646_p13, %p989_p10 }
 0x27a   : > { %p652_p5 = por %p651_p4, %p650_p12 }
 0x27b   : > { %p648_p6 = pneg %p647_p2 }
 0x27c   : > { %p654_p11 = por %p653_p8, %p652_p5 }
 0x27e   : > { %p655_p1 = pnand %p654_p11, %p648_p6 }
 0x280   : > { %658 = shalt.err (!%p655_p1)
}
 0x281   : > { %493 = dma.vmem_to_hbm [thread:$0]  (%p989_p10), %s919_s26, 128, %s917_s29, %s337_s5  }
 0x282 PF: > { %s363_s4 = sand.u32 1, %s697_s9   ;;  %p990_p0 = scmp.ne.s32.totalorder %s979_s22, 0 }
 0x283   : > { %p991_p9 = scmp.ge.s32.totalorder %s717_s14, 2  ;;  %s364_s18 = scalar_lea.sflag [#allocation6], %s363_s4 }
 0x285   : > { %p504_p3 = pnand %p991_p9, %p990_p0 }
 0x287   : > { %692 = dma.done.wait (!%p504_p3), %s364_s18, 128  }
 0x288   : > { %694 = vsyncadd (!%p504_p3), %s364_s18, 4294967168  ;;  %s19_s14 = sadd.s32 1, %s717_s14   ;;  %s992_s9 = smov %s701_s10 }
 0x289   : > { %p16_p7 = scmp.ge.s32.totalorder %s19_s14, 4   ;;  %s993_s10 = smov %s705_s11 }
 0x28a   : > { %s994_s11 = smov %s861_s25  ;;  %s995_s12 = smov %s713_s13 }
 0x28b   : > { %s996_s13 = smov %s998_s28  ;;  %18 = sbr.rel (!%p16_p7) target bundleno = 7 (0x7), region = 87 }
 0x292   :  { %369 = vsyncpa [#allocation5], 1 }
 0x293   :  { %371 = vsyncpa [#allocation5 + $0x1], 1 }
 0x294   :  { %372 = vsyncpa [#allocation8], 1 }
 0x295   :  { %373 = vsyncpa [#allocation6], 1 }
 0x296   :  { %375 = vsyncpa [#allocation6 + $0x1], 1 }

</bundles_post_ra>
